<compile_context>
chip_gen: v6e
topology: v6e:2x2x1
jax: 0.10.0
libtpu: 0.0.40
codegen_flags: <defaults>
</compile_context>

<pallas_src>
import functools

import jax
import jax.numpy as jnp
from jax.experimental import pallas as pl
from jax.experimental.pallas import tpu as pltpu

LANES = 128
ACC_ROWS = 8                 # accumulator / output block: (8, 128) f32 = 4 KiB (one vreg)
TILE_ROWS_MAX = 4096         # (4096, 128) f32 = 2 MiB per input per buffer
NUM_CORES = 2                # "parallel" axis width: dual-TC on v7x, harmless loop on v5e/v6e
EPS = 1e-8


def _round_up(x, m):
    return ((x + m - 1) // m) * m


def _poisson_partial_kernel(pred_ref, targ_ref, out_ref, *,
                            rows, tile_rows, steps_per_core, nblocks):
    c = pl.program_id(0)            # core (parallel) axis
    j = pl.program_id(1)            # reduction (arbitrary) axis
    blk = c * steps_per_core + j    # logical row-block id (blk*tile_rows <= rows, fits int32)

    # The output block (ACC_ROWS, 128) is this core's resident VMEM accumulator.
    @pl.when(j == 0)
    def _():
        out_ref[...] = jnp.zeros_like(out_ref)

    p = jnp.maximum(pred_ref[...].astype(jnp.float32), EPS)    # clamp(min=eps)
    t = targ_ref[...].astype(jnp.float32)
    term = t * jnp.log(p) - p                                   # (tile_rows, 128)

    # Fold (tile_rows,128) -> (ACC_ROWS,128): free tile-aligned view + VPU vreg adds.
    fold = (-1, ACC_ROWS, LANES)

    @pl.when(blk < nblocks - 1)                                 # fully valid tile (common case)
    def _():
        out_ref[...] += term.reshape(fold).sum(axis=0)

    @pl.when(blk == nblocks - 1)                                # (possibly) partial last tile
    def _():
        valid_rows = rows - blk * tile_rows                     # int32 scalar, no overflow
        row_idx = jax.lax.broadcasted_iota(jnp.int32, term.shape, 0)
        masked = jnp.where(row_idx < valid_rows, term, 0.0)     # select -> discards garbage/NaN rows
        out_ref[...] += masked.reshape(fold).sum(axis=0)
    # blk > nblocks - 1 (clamped duplicate block on the last core): contributes nothing.


def stem4d_poisson_loss(predicted, target):
    """Pallas implementation of STEM4D_PoissonLoss.forward."""
    assert predicted.shape == target.shape
    numel = int(predicted.size)

    pred_flat = predicted.reshape(-1)   # free for contiguous inputs
    targ_flat = target.reshape(-1)

    # Kernel covers the (8*128)-aligned prefix; the tail (<=1023 elems) is plain JAX.
    block_elems = ACC_ROWS * LANES
    aligned = (numel // block_elems) * block_elems
    rows = aligned // LANES

    total = jnp.float32(0.0)

    if rows > 0:
        if aligned == numel:
            pred_head, targ_head = pred_flat, targ_flat         # zero-copy path
        else:
            # TODO(synk): XLA may materialize this prefix slice; still avoids the
            # old pad-of-both-tensors and keeps the kernel mask overflow-free.
            pred_head = pred_flat[:aligned]
            targ_head = targ_flat[:aligned]
        pred2d = pred_head.reshape(rows, LANES)
        targ2d = targ_head.reshape(rows, LANES)

        # Tile so that (a) block rows are a multiple of 8, (b) work splits across
        # NUM_CORES when possible, (c) tiles cap at 2 MiB/input/buffer.
        tile_rows = min(TILE_ROWS_MAX, _round_up(pl.cdiv(rows, NUM_CORES), ACC_ROWS))
        nblocks = pl.cdiv(rows, tile_rows)
        steps_per_core = pl.cdiv(nblocks, NUM_CORES)

        def in_map(c, j):
            # Clamp so the (rare) trailing duplicate block never indexes out of range;
            # its contribution is masked off in-kernel.
            return (jnp.minimum(c * steps_per_core + j, nblocks - 1), 0)

        tile_spec = pl.BlockSpec((tile_rows, LANES), in_map)
        kernel = functools.partial(
            _poisson_partial_kernel,
            rows=rows, tile_rows=tile_rows,
            steps_per_core=steps_per_core, nblocks=nblocks)

        partials = pl.pallas_call(
            kernel,
            out_shape=jax.ShapeDtypeStruct((NUM_CORES * ACC_ROWS, LANES), jnp.float32),
            grid_spec=pltpu.PrefetchScalarGridSpec(
                num_scalar_prefetch=0,
                grid=(NUM_CORES, steps_per_core),
                in_specs=[tile_spec, tile_spec],
                out_specs=pl.BlockSpec((ACC_ROWS, LANES), lambda c, j: (c, 0)),
            ),
            compiler_params=pltpu.CompilerParams(
                dimension_semantics=("parallel", "arbitrary"),
            ),
        )(pred2d, targ2d)

        total = total + jnp.sum(partials)   # 2048-element reduction: trivial

    if aligned < numel:                     # <=1023-element tail, plain JAX
        p_tail = jnp.maximum(pred_flat[aligned:].astype(jnp.float32), EPS)
        t_tail = targ_flat[aligned:].astype(jnp.float32)
        total = total + jnp.sum(t_tail * jnp.log(p_tail) - p_tail)

    # Glue: negate and normalize by the element count (scalar ops).
    return -total / jnp.float32(numel)


def _reference_loss(predicted, target):
    p = jnp.maximum(predicted.astype(jnp.float32), EPS)
    t = target.astype(jnp.float32)
    return -jnp.sum(t * jnp.log(p) - p) / predicted.size


def _make_inputs(key, shape):
    k1, k2 = jax.random.split(key)
    predicted = jax.nn.softplus(jax.random.normal(k1, shape, dtype=jnp.float32))
    target = jax.random.poisson(k2, lam=2.0, shape=shape).astype(jnp.float32)
    return predicted, target


if __name__ == "__main__":
    key = jax.random.PRNGKey(0)

    shapes = [
        (2, 4, 16, 16),      # primary small 4D-STEM-like shape (aligned, 2 blocks)
        (3, 5, 17, 19),      # non-aligned size: kernel prefix + plain-JAX tail
        (2, 4, 192, 192),    # mid-size, one block per core
        (8, 4, 256, 256),    # multi-step reduction per core (partial-last-block path)
        (2, 3, 5),           # tiny (< 1024 elems): pure plain-JAX fallback
    ]

    for shape in shapes:
        key, sub = jax.random.split(key)
        predicted, target = _make_inputs(sub, shape)

        loss = stem4d_poisson_loss(predicted, target)
        loss = jax.block_until_ready(loss)

        ref = _reference_loss(predicted, target)
        assert jnp.allclose(loss, ref, rtol=1e-4, atol=1e-5), (shape, loss, ref)

    print("KERNEL_OK")
</pallas_src>

<mosaic_0001>
module attributes {stable_mosaic.version = 11 : i64} {
  func.func @_poisson_partial_kernel(%arg0: i32, %arg1: i32, %arg2: memref<8x128xf32, #tpu.memory_space<vmem>>, %arg3: memref<8x128xf32, #tpu.memory_space<vmem>>, %arg4: memref<8x128xf32, #tpu.memory_space<vmem>>) attributes {dimension_semantics = [#tpu.dimension_semantics<parallel>, #tpu.dimension_semantics<arbitrary>], iteration_bounds = array<i64: 2, 1>, scalar_prefetch = 0 : i64, scratch_operands = 0 : i64, tpu.core_type = #tpu.core_type<tc>, window_params = [{transform_indices = @transform_0, window_bounds = array<i64: 8, 128>}, {transform_indices = @transform_1, window_bounds = array<i64: 8, 128>}, {transform_indices = @transform_2, window_bounds = array<i64: 8, 128>}]} {
    %c1_i32 = arith.constant 1 : i32
    %0 = arith.muli %arg0, %c1_i32 : i32
    %1 = arith.addi %0, %arg1 : i32
    %c0_i32 = arith.constant 0 : i32
    %2 = arith.cmpi eq, %arg1, %c0_i32 : i32
    %3 = arith.extui %2 : i1 to i32
    %c0_i32_0 = arith.constant 0 : i32
    %4 = arith.cmpi ne, %3, %c0_i32_0 : i32
    scf.if %4 {
      %cst_8 = arith.constant 0.000000e+00 : f32
      %18 = vector.broadcast %cst_8 : f32 to vector<8x128xf32>
      %c0_9 = arith.constant 0 : index
      %c0_10 = arith.constant 0 : index
      %19 = vector.load %arg4[%c0_9, %c0_10] : memref<8x128xf32, #tpu.memory_space<vmem>>, vector<8x128xf32>
      tpu.vector_store %arg4[%c0_9, %c0_10], %18 {strides = array<i32>} : memref<8x128xf32, #tpu.memory_space<vmem>>, vector<8x128xf32>,
    } else {
    }
    %c0 = arith.constant 0 : index
    %c0_1 = arith.constant 0 : index
    %5 = vector.load %arg2[%c0, %c0_1] : memref<8x128xf32, #tpu.memory_space<vmem>>, vector<8x128xf32>
    %cst = arith.constant 9.99999993E-9 : f32
    %6 = vector.broadcast %cst : f32 to vector<8x128xf32>
    %7 = arith.maximumf %5, %6 : vector<8x128xf32>
    %c0_2 = arith.constant 0 : index
    %c0_3 = arith.constant 0 : index
    %8 = vector.load %arg3[%c0_2, %c0_3] : memref<8x128xf32, #tpu.memory_space<vmem>>, vector<8x128xf32>
    %9 = math.log %7 : vector<8x128xf32>
    %10 = arith.mulf %8, %9 : vector<8x128xf32>
    %11 = arith.subf %10, %7 : vector<8x128xf32>
    %c1_i32_4 = arith.constant 1 : i32
    %12 = arith.cmpi slt, %1, %c1_i32_4 : i32
    %13 = arith.extui %12 : i1 to i32
    %c0_i32_5 = arith.constant 0 : i32
    %14 = arith.cmpi ne, %13, %c0_i32_5 : i32
    scf.if %14 {
      %c0_8 = arith.constant 0 : index
      %c0_9 = arith.constant 0 : index
      %18 = vector.load %arg4[%c0_8, %c0_9] : memref<8x128xf32, #tpu.memory_space<vmem>>, vector<8x128xf32>
      %19 = vector.shape_cast %11 : vector<8x128xf32> to vector<1x8x128xf32>
      %cst_10 = arith.constant dense<0.000000e+00> : vector<8x128xf32>
      %20 = vector.multi_reduction <add>, %19, %cst_10 [0] : vector<1x8x128xf32> to vector<8x128xf32>
      %21 = arith.addf %18, %20 : vector<8x128xf32>
      %c0_11 = arith.constant 0 : index
      %c0_12 = arith.constant 0 : index
      %22 = vector.load %arg4[%c0_11, %c0_12] : memref<8x128xf32, #tpu.memory_space<vmem>>, vector<8x128xf32>
      tpu.vector_store %arg4[%c0_11, %c0_12], %21 {strides = array<i32>} : memref<8x128xf32, #tpu.memory_space<vmem>>, vector<8x128xf32>,
    } else {
    }
    %c1_i32_6 = arith.constant 1 : i32
    %15 = arith.cmpi eq, %1, %c1_i32_6 : i32
    %16 = arith.extui %15 : i1 to i32
    %c0_i32_7 = arith.constant 0 : i32
    %17 = arith.cmpi ne, %16, %c0_i32_7 : i32
    scf.if %17 {
      %c8_i32 = arith.constant 8 : i32
      %18 = arith.muli %1, %c8_i32 : i32
      %c16_i32 = arith.constant 16 : i32
      %19 = arith.subi %c16_i32, %18 : i32
      %20 = tpu.iota {dimensions = array<i32: 0>} : vector<8x128xi32>
      %21 = vector.broadcast %19 : i32 to vector<8x128xi32>
      %22 = arith.cmpi slt, %20, %21 : vector<8x128xi32>
      %cst_8 = arith.constant 0.000000e+00 : f32
      %23 = vector.broadcast %cst_8 : f32 to vector<8x128xf32>
      %24 = arith.select %22, %11, %23 : vector<8x128xi1>, vector<8x128xf32>
      %c0_9 = arith.constant 0 : index
      %c0_10 = arith.constant 0 : index
      %25 = vector.load %arg4[%c0_9, %c0_10] : memref<8x128xf32, #tpu.memory_space<vmem>>, vector<8x128xf32>
      %26 = vector.shape_cast %24 : vector<8x128xf32> to vector<1x8x128xf32>
      %cst_11 = arith.constant dense<0.000000e+00> : vector<8x128xf32>
      %27 = vector.multi_reduction <add>, %26, %cst_11 [0] : vector<1x8x128xf32> to vector<8x128xf32>
      %28 = arith.addf %25, %27 : vector<8x128xf32>
      %c0_12 = arith.constant 0 : index
      %c0_13 = arith.constant 0 : index
      %29 = vector.load %arg4[%c0_12, %c0_13] : memref<8x128xf32, #tpu.memory_space<vmem>>, vector<8x128xf32>
      tpu.vector_store %arg4[%c0_12, %c0_13], %28 {strides = array<i32>} : memref<8x128xf32, #tpu.memory_space<vmem>>, vector<8x128xf32>,
    } else {
    }
    return
  }
  func.func @transform_0(%arg0: i32, %arg1: i32) -> (i32, i32) {
    %c1_i32 = arith.constant 1 : i32
    %0 = arith.muli %arg0, %c1_i32 : i32
    %1 = arith.addi %0, %arg1 : i32
    %c1_i32_0 = arith.constant 1 : i32
    %2 = arith.minsi %1, %c1_i32_0 : i32
    %c0_i32 = arith.constant 0 : i32
    %c0_i32_1 = arith.constant 0 : i32
    return %2, %c0_i32 : i32, i32
  }
  func.func @transform_1(%arg0: i32, %arg1: i32) -> (i32, i32) {
    %c1_i32 = arith.constant 1 : i32
    %0 = arith.muli %arg0, %c1_i32 : i32
    %1 = arith.addi %0, %arg1 : i32
    %c1_i32_0 = arith.constant 1 : i32
    %2 = arith.minsi %1, %c1_i32_0 : i32
    %c0_i32 = arith.constant 0 : i32
    %c0_i32_1 = arith.constant 0 : i32
    return %2, %c0_i32 : i32, i32
  }
  func.func @transform_2(%arg0: i32, %arg1: i32) -> (i32, i32) {
    %c0_i32 = arith.constant 0 : i32
    %c0_i32_0 = arith.constant 0 : i32
    return %arg0, %c0_i32 : i32, i32
  }
}

</mosaic_0001>

<bundles_post_ra>
// kernel: tpu_custom_call.1
= control target key start
LH: loop header
LB: loop body
LE: loop exit
PB: predicated region body
PF: predicated region fallthrough
CT: control target
= control target key end

     0   :  { %s888_s0 = inlined_call_operand.hbm [shape: f32[16,128], index: 0, kind: input, shape index: {}]   ;;  %s889_s1 = inlined_call_operand.hbm [shape: f32[16,128], index: 1, kind: input, shape index: {}]   ;;  %s890_s2 = inlined_call_operand.hbm [shape: f32[16,128], index: 2, kind: output, shape index: {}]  }
   0x1   :  { %891 = sst [smem:[#allocation11_spill]] %s888_s0 }
   0x2   :  { %7 = vsyncpa [#allocation3], 0 }
   0x3   :  { %9 = vsyncpa [#allocation3 + $0x1], 0 }
   0x4   :  { %10 = vsyncpa [#allocation6], 0 }
   0x5   :  { %12 = vsyncpa [#allocation6 + $0x1], 0 }
   0x6   :  { %13 = vsyncpa [#allocation4], 0 }
   0x7   :  { %15 = vsyncpa [#allocation4 + $0x1], 0  ;;  %s681_s9 = smov 0   ;;  %s683_s10 = smov 0  }
   0x8   :  { %s685_s11 = smov 0   ;;  %s687_s12 = smov 0  }
   0x9   :  { %s689_s13 = smov 0   ;;  %s691_s14 = smov 0  }
   0xa   :  { %s693_s15 = smov 0   ;;  %s695_s16 = smov 0  }
   0xb   :  { %s697_s17 = smov 0  }
   0xc LB: > { %s383_s18 = sadd.s32 4294967295, %s660_s17   ;;  %s384_s19 = sadd.s32 4294967294, %s660_s17   ;;  %s660_s17 = sphi %s697_s17, %s21_s17   ;;  %s656_s16 = sphi %s695_s16, %s907_s16   ;;  %s652_s15 = sphi %s693_s15, %s906_s15   ;;  %s648_s14 = sphi %s691_s14, %s905_s14   ;;  %s644_s13 = sphi %s689_s13, %s904_s13   ;;  %s640_s12 = sphi %s687_s12, %s903_s12   ;;  %s636_s11 = sphi %s685_s11, %s902_s11   ;;  %s632_s10 = sphi %s683_s10, %s901_s10   ;;  %s628_s9 = sphi %s681_s9, %s900_s9  }
   0xd   : > { %s33_s20 = sadd.s32 1, %s656_s16  ;;  %p38_p0 = scmp.lt.s32.totalorder %s656_s16, 1 }
   0xe   : > { %p35_p1 = scmp.ge.s32.totalorder %s33_s20, 2  ;;  %s46_s21 = sadd.s32 1, %s648_s14 }
   0xf   : > { %s730_s22 = scalar_select %p38_p0, %s656_s16, 1 }
  0x10   : > { %s909_s20 = smov (%p35_p1, %s33_s20), 0  ;;  %p53_p2 = scmp.ne.s32.totalorder %s648_s14, %s644_s13 }
  0x11   : > { %p54_p3 = scmp.eq.s32.totalorder %s660_s17, 0  ;;  %p41_p4 = scmp.lt.s32.totalorder %s909_s20, 1 }
  0x12   : > { %p59_p5 = scmp.ne.s32.totalorder %s644_s13, %s640_s12  ;;  %p60_p7 = scmp.eq.s32.totalorder %s383_s18, 0 }
  0x13   : > { %p739_p6 = por %p54_p3, %p53_p2  ;;  %s101_s26 = ssub.s32 %s656_s16, %s909_s20 }
  0x14   : > { %s42_s24 = scalar_select %p41_p4, %s909_s20, 1 }
  0x15   : > { %p744_p8 = por %p60_p7, %p59_p5  ;;  %p102_p9 = scmp.eq.s32.totalorder %s101_s26, 0 }
  0x16   : > { %s43_s27 = ssub.s32 %s730_s22, %s42_s24  ;;  %s104_s28 = sadd.s32 1, %s636_s11 }
  0x17   : > { %p44_p10 = scmp.eq.s32.totalorder %s43_s27, 0  ;;  %p114_p11 = scmp.ne.s32.totalorder %s636_s11, %s632_s10 }
  0x18   : > { %s753_s29 = scalar_select %p102_p9, %s636_s11, %s104_s28  }
  0x19   : > { %s756_s30 = scalar_select %p44_p10, %s648_s14, %s46_s21  }
  0x1a   : > { %p115_p12 = scmp.eq.s32.totalorder %s383_s18, 1  ;;  %p120_p13 = scmp.ne.s32.totalorder %s632_s10, %s628_s9 }
  0x1b   : > { %p121_p0 = scmp.eq.s32.totalorder %s384_s19, 1  ;;  %p419_p4 = scmp.lt.s32.totalorder %s660_s17, 2 }
  0x1c   : > { %p762_p1 = por %p115_p12, %p114_p11  ;;  %s773_s5 = sand.u32 1, %s648_s14  }
  0x1d   : > { %p767_p3 = por %p121_p0, %p120_p13  ;;  %s388_s6 = sshll.u32 %s730_s22, 7 }
  0x1e   : > { %s387_s7 = sshll.u32 %s773_s5, 3  ;;  %s896_s0 = sld [smem:[#allocation11_spill]] }
  0x1f   : > { %s145_s19 = scalar_lea.vmem [#allocation2], %s387_s7  ;;  %p782_p5 = pnand %p419_p4, %p739_p6 }
  0x20   : > { %s155_s21 = sshll.u32 %s145_s19, 4  ;;  %p391_p7 = scmp.ge.s32.totalorder %s660_s17, 1  ;;  %s156_s21 = int_to_ptr.vmem [resolvable:$true] %s155_s21 }
  0x21   : > { %p181_p9 = scmp.lt.s32.totalorder %s660_s17, 3  ;;  %s142_s26 = scalar_lea.sflag [#allocation3], %s773_s5 }
  0x22   : > { %p498_p10 = pneg %p782_p5  ;;  %s509_s22 = scalar_lea.vmem %s156_s21, 128 }
  0x23   : > { %p510_p11 = scmp.ne.s32.totalorder %s156_s21, %s509_s22  ;;  %s662_s27 = smov [#allocation2]  }
  0x24   : > { %s153_s18 = scalar_lea.hbm %s896_s0, %s388_s6  ;;  %s514_s23 = sshll.u32 %s662_s27, 4  ;;  %s515_s23 = int_to_ptr.vmem [resolvable:$false] %s514_s23 }
  0x25   : > { %p512_p12 = pnand %p510_p11, %p498_p10  ;;  %s516_s28 = scalar_lea.vmem %s515_s23, 256 }
  0x26   : > { %p517_p6 = scmp.lt.s32.totalorder %s156_s21, %s515_s23  ;;  %p518_p0 = scmp.lt.s32.totalorder %s516_s28, %s509_s22 }
  0x27   : > { %p513_p13 = pneg %p512_p12 }
  0x28   : > { %p519_p4 = por %p518_p0, %p517_p6 }
  0x2a   : > { %p520_p2 = pnand %p519_p4, %p513_p13 }
  0x2c   : > { %523 = shalt.err (!%p520_p2)
}
  0x2d   : > { %411 = dma.hbm_to_vmem [thread:$0]  (!%p782_p5), %s153_s18, 128, %s156_s21, %s142_s26  }
  0x2e   : > { %p800_p11 = pnand %p391_p7, %p181_p9  ;;  %s174_s22 = scalar_lea.hbm %s889_s1, %s388_s6 }
  0x2f   : > { %s166_s27 = scalar_lea.vmem [#allocation5], %s387_s7  ;;  %s163_s28 = scalar_lea.sflag [#allocation6], %s773_s5 }
  0x30   : > { %s176_s23 = sshll.u32 %s166_s27, 4  ;;  %s663_s18 = smov [#allocation5]   ;;  %s177_s23 = int_to_ptr.vmem [resolvable:$true] %s176_s23 }
  0x31   : > { %s537_s0 = scalar_lea.vmem %s177_s23, 128  ;;  %s542_s21 = sshll.u32 %s663_s18, 4  ;;  %s543_s21 = int_to_ptr.vmem [resolvable:$false] %s542_s21 }
  0x32   : > { %p538_p2 = scmp.ne.s32.totalorder %s177_s23, %s537_s0  ;;  %s544_s26 = scalar_lea.vmem %s543_s21, 256 }
  0x33   : > { %p545_p7 = scmp.lt.s32.totalorder %s177_s23, %s543_s21  ;;  %p546_p9 = scmp.lt.s32.totalorder %s544_s26, %s537_s0 }
  0x34   : > { %p540_p12 = pnand %p538_p2, %p498_p10 }
  0x35   : > { %p547_p6 = por %p546_p9, %p545_p7 }
  0x36   : > { %p541_p13 = pneg %p540_p12 }
  0x38   : > { %p548_p0 = pnand %p547_p6, %p541_p13 }
  0x3a   : > { %551 = shalt.err (!%p548_p0)
}
  0x3b   : > { %414 = dma.hbm_to_vmem [thread:$0]  (!%p782_p5), %s174_s22, 128, %s177_s23, %s163_s28  }
  0x3c   : > { %185 = sbr.rel (%p800_p11) target bundleno = 133 (0x85), region = 28  ;;  %s187_s5 = sand.u32 (!%p800_p11), 1, %s644_s13  }
  0x3d   : > { %s392_s6 = sshll.u32 (!%p800_p11), %s187_s5, 3  ;;  %s188_s7 = scalar_lea.sflag (!%p800_p11), [#allocation3], %s187_s5 }
  0x3e   : > { %s191_s12 = scalar_lea.vmem (!%p800_p11), [#allocation2], %s392_s6 }
  0x41   : > { %615 = dma.done.wait (%p744_p8), %s188_s7, 128  }
  0x42   : > { %617 = vsyncadd (%p744_p8), %s188_s7, 4294967168  ;;  %s197_s0 = scalar_lea.sflag [#allocation6], %s187_s5  ;;  %s200_s19 = scalar_lea.vmem [#allocation5], %s392_s6 }
  0x43   : > { %619 = dma.done.wait (%p744_p8), %s197_s0, 128  }
  0x44   : > { %621 = vsyncadd (%p744_p8), %s197_s0, 4294967168  ;;  %s223_s24 = sand.u32 1, %s632_s10   ;;  %v664_v0 = vmov 0.0   ;;  %v238_v1 = vld [vmem:[%s191_s12] sm:$0xff]  ;;  %v240_v4 = vld [vmem:[%s200_s19] sm:$0xff]  ;;  %p395_p8 = scmp.ge.s32.totalorder %s652_s15, 1 }
  0x45   : > { %s394_s8 = sshll.u32 %s223_s24, 3  ;;  %v239_v2 = vmax.f32 %v238_v1, 1e-08 }
  0x46   : > { %s827_s22 = scalar_lea.vmem [#allocation7], %s394_s8 }
  0x47   : > { %237 = vst [vmem:[%s827_s22] sm:$0xff] %v664_v0  ;;  %494 = vlog2.f32 %v239_v2 }
  0x54   : > { %v495_v3 = vpop.eup %494 }
  0x55   : > { %v242_v5 = vmul.f32 0.6931472, %v495_v3  ;;  %248 = sbr.rel (%p395_p8) target bundleno = 94 (0x5e), region = 44 }
  0x57   : > { %v243_v6 = vmul.f32 %v242_v5, %v240_v4 }
  0x59   : > { %v244_v7 = vsub.f32 %v243_v6, %v239_v2 }
  0x5a   : > { %v249_v8 = vld [vmem:[%s827_s22] sm:$0xff] }
  0x5b   : > { %v251_v9 = vadd.f32 %v249_v8, %v244_v7 }
  0x5d   : > { %252 = vst [vmem:[%s827_s22] sm:$0xff] %v251_v9 }
  0x5e PF: > { %p396_p5 = scmp.ne.s32.totalorder %s652_s15, 1 }
  0x5f   : > { %s397_s25 = sshll.u32 (!%p396_p5), %s652_s15, 3 }
  0x60   : > { %256 = sbr.rel (%p396_p5) target bundleno = 110 (0x6e), region = 48  ;;  %s258_s27 = ssub.s32 (!%p396_p5), 16, %s397_s25 }
  0x65   : > { %v259_v10 = vlaneseq  ;;  %v261_v12 = vstv %s258_s27  ;;  %v264_v13 = vld [vmem:[%s827_s22] sm:$0xff] }
  0x67   : > { %v260_v11 = vshrl.u32 %v259_v10, 7 }
  0x69   : > { %vm262_vm0 = vcmp.lt.s32.totalorder %v260_v11, %v261_v12 }
  0x6a   : > { %v263_v14 = vsel %vm262_vm0, %v244_v7, 0.0 }
  0x6b   : > { %v266_v15 = vadd.f32 %v264_v13, %v263_v14 }
  0x6d   : > { %267 = vst [vmem:[%s827_s22] sm:$0xff] %v266_v15 }
  0x6e PF: > { %s399_s23 = sshll.u32 %s652_s15, 7  ;;  %s282_s26 = sshll.u32 %s827_s22, 4  ;;  %s283_s26 = int_to_ptr.vmem [resolvable:$true] %s282_s26 }
  0x6f   : > { %s280_s21 = scalar_lea.hbm %s890_s2, %s399_s23  ;;  %s269_s5 = scalar_lea.sflag [#allocation4], %s223_s24 }
  0x70   : > { %s552_s6 = scalar_lea.vmem %s283_s26, 128  ;;  %s665_s7 = smov [#allocation7]  }
  0x71   : > { %p553_p10 = scmp.ne.s32.totalorder %s283_s26, %s552_s6  ;;  %s556_s12 = sshll.u32 %s665_s7, 4  ;;  %s557_s12 = int_to_ptr.vmem [resolvable:$false] %s556_s12 }
  0x72   : > { %s558_s0 = scalar_lea.vmem %s557_s12, 256  ;;  %p559_p2 = scmp.lt.s32.totalorder %s283_s26, %s557_s12 }
  0x73   : > { %p554_p4 = pnand %p553_p10, %p762_p1  ;;  %p560_p12 = scmp.lt.s32.totalorder %s558_s0, %s552_s6 }
  0x75   : > { %p555_p11 = pneg %p554_p4  ;;  %p561_p13 = por %p560_p12, %p559_p2 }
  0x77   : > { %p562_p7 = pnand %p561_p13, %p555_p11 }
  0x79   : > { %565 = shalt.err (!%p562_p7)
}
  0x7a   : > { %s566_s15 = scalar_lea.hbm %s280_s21, 128  ;;  %s570_s8 = scalar_lea.hbm %s890_s2, 256 }
  0x7b   : > { %p567_p9 = scmp.ne.s32.totalorder %s280_s21, %s566_s15  ;;  %p571_p8 = scmp.lt.s32.totalorder %s280_s21, %s890_s2 }
  0x7c   : > { %p572_p5 = scmp.lt.s32.totalorder %s570_s8, %s566_s15 }
  0x7d   : > { %p568_p6 = pnand %p567_p9, %p762_p1 }
  0x7e   : > { %p573_p10 = por %p572_p5, %p571_p8 }
  0x7f   : > { %p569_p0 = pneg %p568_p6 }
  0x81   : > { %p574_p4 = pnand %p573_p10, %p569_p0 }
  0x83   : > { %577 = shalt.err (!%p574_p4)
}
  0x84   : > { %406 = dma.vmem_to_hbm [thread:$0]  (%p762_p1), %s283_s26, 128, %s280_s21, %s269_s5  }
  0x85 PF: > { %s294_s27 = sand.u32 1, %s628_s9   ;;  %p899_p11 = scmp.ge.s32.totalorder %s660_s17, 2 }
  0x86   : > { %s295_s23 = scalar_lea.sflag [#allocation4], %s294_s27 }
  0x87   : > { %p416_p2 = pnand %p899_p11, %p767_p3 }
  0x89   : > { %p417_p12 = pneg %p416_p2 }
  0x8b   : > { %623 = dma.done.wait (%p417_p12), %s295_s23, 128  }
  0x8c   : > { %625 = vsyncadd (%p417_p12), %s295_s23, 4294967168  ;;  %s21_s17 = sadd.s32 1, %s660_s17   ;;  %s900_s9 = smov %s632_s10 }
  0x8d   : > { %p18_p13 = scmp.ge.s32.totalorder %s21_s17, 4   ;;  %s901_s10 = smov %s636_s11 }
  0x8e   : > { %s902_s11 = smov %s753_s29  ;;  %s903_s12 = smov %s644_s13 }
  0x8f   : > { %s904_s13 = smov %s648_s14  ;;  %s905_s14 = smov %s756_s30 }
  0x90   : > { %s906_s15 = smov %s656_s16  ;;  %s907_s16 = smov %s909_s20 }
  0x91   :  { %20 = sbr.rel (!%p18_p13) target bundleno = 12 (0xc), region = 98 }
  0x96   :  { %300 = vsyncpa [#allocation3], 1 }
  0x97   :  { %302 = vsyncpa [#allocation3 + $0x1], 1 }
  0x98   :  { %303 = vsyncpa [#allocation6], 1 }
  0x99   :  { %305 = vsyncpa [#allocation6 + $0x1], 1 }
  0x9a   :  { %306 = vsyncpa [#allocation4], 1 }
  0x9b   :  { %308 = vsyncpa [#allocation4 + $0x1], 1 }

</bundles_post_ra>
